<compile_context>
chip_gen: v5e
topology: v5e:2x2
jax: 0.10.0
libtpu: 0.0.40
codegen_flags: <defaults>
</compile_context>

<pallas_src>
import functools

import jax
import jax.numpy as jnp
from jax.experimental import pallas as pl
from jax.experimental.pallas import tpu as pltpu


def _channel_attention_kernel(x_ref, w1_ref, w2_ref, o_ref, sum_ref, max_ref,
                              *, hw, hw_tile):
    """One grid step: accumulate a (C, hw_tile) spatial chunk of one image.

    x_ref:   (1, C, hw_tile)  input chunk (C on sublanes, spatial on lanes)
    w1_ref:  (Cr, C)          fc[0].weight, PyTorch (out, in) layout
    w2_ref:  (C, Cr)          fc[2].weight, PyTorch (out, in) layout
    o_ref:   (1, C, 1)        sigmoid gate for this image
    sum_ref / max_ref: (C, hw_tile) f32 running elementwise sum / max
    """
    k = pl.program_id(1)

    # --- init accumulators at the first spatial chunk of this image ---------
    @pl.when(k == 0)
    def _init():
        sum_ref[...] = jnp.zeros_like(sum_ref)
        max_ref[...] = jnp.full_like(max_ref, -jnp.inf)

    x = x_ref[0].astype(jnp.float32)                       # (C, hw_tile)

    if hw % hw_tile != 0:
        # Ragged last chunk: mask out-of-range lanes (0 for sum, -inf for max).
        pos = k * hw_tile + jax.lax.broadcasted_iota(jnp.int32, x.shape, 1)
        valid = pos < hw
        x_sum = jnp.where(valid, x, 0.0)
        x_max = jnp.where(valid, x, -jnp.inf)
    else:
        x_sum = x
        x_max = x

    # Pure VPU elementwise accumulate (free filler under the DMA bottleneck).
    sum_ref[...] = sum_ref[...] + x_sum
    max_ref[...] = jnp.maximum(max_ref[...], x_max)

    # --- finalize: pools -> shared MLP -> sigmoid gate (once per image) -----
    @pl.when(k == pl.num_programs(1) - 1)
    def _finalize():
        avg = jnp.sum(sum_ref[...], axis=1, keepdims=True) * (1.0 / hw)  # (C,1)
        mx = jnp.max(max_ref[...], axis=1, keepdims=True)                # (C,1)
        # Put avg / max in lanes 0 / 1 of one (C, 2) operand so the shared MLP
        # is a single pair of matmuls (M=2) instead of two M=1 passes.
        lane = jax.lax.broadcasted_iota(jnp.int32, (avg.shape[0], 2), 1)
        pooled = jnp.where(lane == 0, avg, mx)                           # (C,2)
        h = jnp.dot(w1_ref[...], pooled, preferred_element_type=jnp.float32)
        h = jnp.maximum(h, 0.0)                                          # (Cr,2)
        o2 = jnp.dot(w2_ref[...], h, preferred_element_type=jnp.float32)  # (C,2)
        gate = jax.nn.sigmoid(o2[:, 0:1] + o2[:, 1:2])                   # (C,1)
        o_ref[0] = gate.astype(o_ref.dtype)


def _pick_hw_tile(hw, c, itemsize, target_block_bytes):
    """Largest lane-aligned spatial tile whose (C, tile) block fits the budget."""
    cap = max(128, (target_block_bytes // max(1, c * itemsize)) // 128 * 128)
    return hw if hw <= cap else cap


def channel_attention(x_nchw, w1_oi, w2_oi, *, hw_tile=None,
                      target_block_bytes=4 * 1024 * 1024):
    """x_nchw: (B, C, H, W). w1_oi: (Cr, C). w2_oi: (C, Cr). Returns (B, C, 1, 1)."""
    B, C, H, W = x_nchw.shape
    Cr = w1_oi.shape[0]
    HW = H * W

    # Native layout, no transpose: (B, C, H*W) is a free reshape of NCHW.
    x = x_nchw.reshape(B, C, HW)

    if hw_tile is None:
        hw_tile = _pick_hw_tile(HW, C, jnp.dtype(x.dtype).itemsize,
                                target_block_bytes)
    n_hw = pl.cdiv(HW, hw_tile)

    kernel = functools.partial(_channel_attention_kernel, hw=HW, hw_tile=hw_tile)

    out = pl.pallas_call(
        kernel,
        out_shape=jax.ShapeDtypeStruct((B, C, 1), jnp.float32),
        grid_spec=pltpu.PrefetchScalarGridSpec(
            num_scalar_prefetch=0,
            grid=(B, n_hw),                         # reduction (spatial) axis last
            in_specs=[
                pl.BlockSpec((1, C, hw_tile), lambda b, k: (b, 0, k)),
                # Constant index maps -> weights DMA'd once, not re-fetched per step.
                pl.BlockSpec((Cr, C), lambda b, k: (0, 0)),
                pl.BlockSpec((C, Cr), lambda b, k: (0, 0)),
            ],
            out_specs=pl.BlockSpec((1, C, 1), lambda b, k: (b, 0, 0)),
            scratch_shapes=[
                pltpu.VMEM((C, hw_tile), jnp.float32),   # running sum
                pltpu.VMEM((C, hw_tile), jnp.float32),   # running max
            ],
        ),
        compiler_params=pltpu.CompilerParams(
            dimension_semantics=("parallel", "arbitrary"),
            vmem_limit_bytes=32 * 1024 * 1024,
        ),
    )(x, w1_oi, w2_oi)

    return out.reshape(B, C, 1, 1)


def channel_attention_ref(x_nchw, w1_oi, w2_oi):
    """Pure-JAX reference matching the PyTorch module."""
    avg = jnp.mean(x_nchw, axis=(2, 3))  # (B, C)
    mx = jnp.max(x_nchw, axis=(2, 3))    # (B, C)

    def fc(v):  # v: (B, C)
        h = jnp.maximum(v @ w1_oi.T, 0.0)  # (B, Cr)
        return h @ w2_oi.T                 # (B, C)

    out = jax.nn.sigmoid(fc(avg) + fc(mx))
    return out[:, :, None, None]


if __name__ == "__main__":
    key = jax.random.PRNGKey(0)
    kx, k1, k2 = jax.random.split(key, 3)

    # in_planes must be divisible by 16 (the module hardcodes // 16).
    B, C, H, W = 2, 32, 16, 16
    Cr = C // 16
    x = jax.random.normal(kx, (B, C, H, W), dtype=jnp.float32)
    # PyTorch conv weight layout (out, in, 1, 1), kept without the 1x1 dims.
    w1 = jax.random.normal(k1, (Cr, C), dtype=jnp.float32) * 0.1   # fc[0].weight
    w2 = jax.random.normal(k2, (C, Cr), dtype=jnp.float32) * 0.1   # fc[2].weight

    out = jax.block_until_ready(channel_attention(x, w1, w2))
    ref = channel_attention_ref(x, w1, w2)
    assert out.shape == (B, C, 1, 1)
    assert jnp.allclose(out, ref, atol=1e-5, rtol=1e-5)

    # Exercise the multi-step streaming reduction (spatial grid axis > 1).
    out2 = jax.block_until_ready(channel_attention(x, w1, w2, hw_tile=128))
    assert jnp.allclose(out2, ref, atol=1e-5, rtol=1e-5)

    # Exercise the ragged-tail masking path (HW = 144 vs tile 128).
    x3 = jax.random.normal(kx, (B, C, 12, 12), dtype=jnp.float32)
    out3 = jax.block_until_ready(channel_attention(x3, w1, w2, hw_tile=128))
    ref3 = channel_attention_ref(x3, w1, w2)
    assert jnp.allclose(out3, ref3, atol=1e-5, rtol=1e-5)

    print("KERNEL_OK")
</pallas_src>

<mosaic_0001>
module attributes {stable_mosaic.version = 11 : i64} {
  func.func @_channel_attention_kernel(%arg0: i32, %arg1: i32, %arg2: memref<1x32x256xf32, #tpu.memory_space<vmem>>, %arg3: memref<2x32xf32, #tpu.memory_space<vmem>>, %arg4: memref<32x2xf32, #tpu.memory_space<vmem>>, %arg5: memref<1x32x1xf32, #tpu.memory_space<vmem>>, %arg6: memref<32x256xf32, #tpu.memory_space<vmem>>, %arg7: memref<32x256xf32, #tpu.memory_space<vmem>>) attributes {dimension_semantics = [#tpu.dimension_semantics<parallel>, #tpu.dimension_semantics<arbitrary>], iteration_bounds = array<i64: 2, 1>, scalar_prefetch = 0 : i64, scratch_operands = 2 : i64, tpu.core_type = #tpu.core_type<tc>, window_params = [{transform_indices = @transform_0, window_bounds = array<i64: 1, 32, 256>}, {pipeline_mode = #tpu.pipeline_mode<synchronous>, transform_indices = @transform_1, window_bounds = array<i64: 2, 32>}, {pipeline_mode = #tpu.pipeline_mode<synchronous>, transform_indices = @transform_2, window_bounds = array<i64: 32, 2>}, {transform_indices = @transform_3, window_bounds = array<i64: 1, 32, 1>}]} {
    %c0_i32 = arith.constant 0 : i32
    %0 = arith.cmpi eq, %arg1, %c0_i32 : i32
    %1 = arith.extui %0 : i1 to i32
    %c0_i32_0 = arith.constant 0 : i32
    %2 = arith.cmpi ne, %1, %c0_i32_0 : i32
    scf.if %2 {
      %cst = arith.constant 0.000000e+00 : f32
      %14 = vector.broadcast %cst : f32 to vector<32x256xf32>
      %c0_13 = arith.constant 0 : index
      %c0_14 = arith.constant 0 : index
      %15 = vector.load %arg6[%c0_13, %c0_14] : memref<32x256xf32, #tpu.memory_space<vmem>>, vector<32x256xf32>
      tpu.vector_store %arg6[%c0_13, %c0_14], %14 {strides = array<i32>} : memref<32x256xf32, #tpu.memory_space<vmem>>, vector<32x256xf32>,
      %cst_15 = arith.constant 0xFF800000 : f32
      %16 = vector.broadcast %cst_15 : f32 to vector<32x256xf32>
      %c0_16 = arith.constant 0 : index
      %c0_17 = arith.constant 0 : index
      %17 = vector.load %arg7[%c0_16, %c0_17] : memref<32x256xf32, #tpu.memory_space<vmem>>, vector<32x256xf32>
      tpu.vector_store %arg7[%c0_16, %c0_17], %16 {strides = array<i32>} : memref<32x256xf32, #tpu.memory_space<vmem>>, vector<32x256xf32>,
    } else {
    }
    %c0 = arith.constant 0 : index
    %c0_1 = arith.constant 0 : index
    %c0_2 = arith.constant 0 : index
    %3 = vector.load %arg2[%c0, %c0_1, %c0_2] : memref<1x32x256xf32, #tpu.memory_space<vmem>>, vector<1x32x256xf32>
    %4 = vector.shape_cast %3 : vector<1x32x256xf32> to vector<32x256xf32>
    %c0_3 = arith.constant 0 : index
    %c0_4 = arith.constant 0 : index
    %5 = vector.load %arg6[%c0_3, %c0_4] : memref<32x256xf32, #tpu.memory_space<vmem>>, vector<32x256xf32>
    %6 = arith.addf %5, %4 : vector<32x256xf32>
    %c0_5 = arith.constant 0 : index
    %c0_6 = arith.constant 0 : index
    %7 = vector.load %arg6[%c0_5, %c0_6] : memref<32x256xf32, #tpu.memory_space<vmem>>, vector<32x256xf32>
    tpu.vector_store %arg6[%c0_5, %c0_6], %6 {strides = array<i32>} : memref<32x256xf32, #tpu.memory_space<vmem>>, vector<32x256xf32>,
    %c0_7 = arith.constant 0 : index
    %c0_8 = arith.constant 0 : index
    %8 = vector.load %arg7[%c0_7, %c0_8] : memref<32x256xf32, #tpu.memory_space<vmem>>, vector<32x256xf32>
    %9 = arith.maximumf %8, %4 : vector<32x256xf32>
    %c0_9 = arith.constant 0 : index
    %c0_10 = arith.constant 0 : index
    %10 = vector.load %arg7[%c0_9, %c0_10] : memref<32x256xf32, #tpu.memory_space<vmem>>, vector<32x256xf32>
    tpu.vector_store %arg7[%c0_9, %c0_10], %9 {strides = array<i32>} : memref<32x256xf32, #tpu.memory_space<vmem>>, vector<32x256xf32>,
    %c0_i32_11 = arith.constant 0 : i32
    %11 = arith.cmpi eq, %arg1, %c0_i32_11 : i32
    %12 = arith.extui %11 : i1 to i32
    %c0_i32_12 = arith.constant 0 : i32
    %13 = arith.cmpi ne, %12, %c0_i32_12 : i32
    scf.if %13 {
      %c0_13 = arith.constant 0 : index
      %c0_14 = arith.constant 0 : index
      %14 = vector.load %arg6[%c0_13, %c0_14] : memref<32x256xf32, #tpu.memory_space<vmem>>, vector<32x256xf32>
      %cst = arith.constant dense<0.000000e+00> : vector<32xf32>
      %15 = vector.multi_reduction <add>, %14, %cst [1] : vector<32x256xf32> to vector<32xf32>
      %16 = vector.shape_cast %15 : vector<32xf32> to vector<32x1xf32>
      %cst_15 = arith.constant 3.906250e-03 : f32
      %17 = vector.broadcast %cst_15 : f32 to vector<32x1xf32>
      %18 = arith.mulf %16, %17 : vector<32x1xf32>
      %c0_16 = arith.constant 0 : index
      %c0_17 = arith.constant 0 : index
      %19 = vector.load %arg7[%c0_16, %c0_17] : memref<32x256xf32, #tpu.memory_space<vmem>>, vector<32x256xf32>
      %cst_18 = arith.constant dense<0xFF800000> : vector<32xf32>
      %20 = vector.multi_reduction <maximumf>, %19, %cst_18 [1] : vector<32x256xf32> to vector<32xf32>
      %21 = vector.shape_cast %20 : vector<32xf32> to vector<32x1xf32>
      %22 = tpu.iota {dimensions = array<i32: 1>} : vector<32x2xi32>
      %c0_i32_19 = arith.constant 0 : i32
      %23 = vector.broadcast %c0_i32_19 : i32 to vector<32x2xi32>
      %24 = arith.cmpi eq, %22, %23 : vector<32x2xi32>
      %25 = vector.shape_cast %18 : vector<32x1xf32> to vector<32x1xf32>
      %26 = vector.broadcast %25 : vector<32x1xf32> to vector<32x2xf32>
      %27 = vector.shape_cast %21 : vector<32x1xf32> to vector<32x1xf32>
      %28 = vector.broadcast %27 : vector<32x1xf32> to vector<32x2xf32>
      %29 = arith.select %24, %26, %28 : vector<32x2xi1>, vector<32x2xf32>
      %c0_20 = arith.constant 0 : index
      %c0_21 = arith.constant 0 : index
      %30 = vector.load %arg3[%c0_20, %c0_21] : memref<2x32xf32, #tpu.memory_space<vmem>>, vector<2x32xf32>
      %cst_22 = arith.constant dense<0.000000e+00> : vector<2x2xf32>
      %31 = tpu.matmul %30, %29, %cst_22 {dimension_numbers = #tpu.dot_dimension_numbers<[1], [0], [0], [1], [0, 0, 1, 1], [], []>} : vector<2x32xf32>, vector<32x2xf32>, vector<2x2xf32> -> vector<2x2xf32>
      %cst_23 = arith.constant 0.000000e+00 : f32
      %32 = vector.broadcast %cst_23 : f32 to vector<2x2xf32>
      %33 = arith.maximumf %31, %32 : vector<2x2xf32>
      %c0_24 = arith.constant 0 : index
      %c0_25 = arith.constant 0 : index
      %34 = vector.load %arg4[%c0_24, %c0_25] : memref<32x2xf32, #tpu.memory_space<vmem>>, vector<32x2xf32>
      %cst_26 = arith.constant dense<0.000000e+00> : vector<32x2xf32>
      %35 = tpu.matmul %34, %33, %cst_26 {dimension_numbers = #tpu.dot_dimension_numbers<[1], [0], [0], [1], [0, 0, 1, 1], [], []>} : vector<32x2xf32>, vector<2x2xf32>, vector<32x2xf32> -> vector<32x2xf32>
      %36 = vector.extract_strided_slice %35 {offsets = [0, 0], sizes = [32, 1], strides = [1, 1]} : vector<32x2xf32> to vector<32x1xf32>
      %37 = vector.extract_strided_slice %35 {offsets = [0, 1], sizes = [32, 1], strides = [1, 1]} : vector<32x2xf32> to vector<32x1xf32>
      %38 = arith.addf %36, %37 : vector<32x1xf32>
      %39 = arith.negf %38 : vector<32x1xf32>
      %40 = math.exp %39 : vector<32x1xf32>
      %cst_27 = arith.constant 1.000000e+00 : f32
      %41 = vector.broadcast %cst_27 : f32 to vector<32x1xf32>
      %42 = arith.addf %41, %40 : vector<32x1xf32>
      %43 = arith.divf %41, %42 : vector<32x1xf32>
      %c0_28 = arith.constant 0 : index
      %c0_29 = arith.constant 0 : index
      %c0_30 = arith.constant 0 : index
      %44 = vector.load %arg5[%c0_28, %c0_29, %c0_30] : memref<1x32x1xf32, #tpu.memory_space<vmem>>, vector<1x32x1xf32>
      %45 = vector.shape_cast %44 : vector<1x32x1xf32> to vector<32x1xf32>
      %46 = vector.shape_cast %43 : vector<32x1xf32> to vector<1x32x1xf32>
      tpu.vector_store %arg5[%c0_28, %c0_29, %c0_30], %46 {strides = array<i32>} : memref<1x32x1xf32, #tpu.memory_space<vmem>>, vector<1x32x1xf32>,
    } else {
    }
    return
  }
  func.func @transform_0(%arg0: i32, %arg1: i32) -> (i32, i32, i32) {
    %c0_i32 = arith.constant 0 : i32
    %c0_i32_0 = arith.constant 0 : i32
    return %arg0, %c0_i32, %arg1 : i32, i32, i32
  }
  func.func @transform_1(%arg0: i32, %arg1: i32) -> (i32, i32) {
    %c0_i32 = arith.constant 0 : i32
    %c0_i32_0 = arith.constant 0 : i32
    %c0_i32_1 = arith.constant 0 : i32
    return %c0_i32, %c0_i32_0 : i32, i32
  }
  func.func @transform_2(%arg0: i32, %arg1: i32) -> (i32, i32) {
    %c0_i32 = arith.constant 0 : i32
    %c0_i32_0 = arith.constant 0 : i32
    %c0_i32_1 = arith.constant 0 : i32
    return %c0_i32, %c0_i32_0 : i32, i32
  }
  func.func @transform_3(%arg0: i32, %arg1: i32) -> (i32, i32, i32) {
    %c0_i32 = arith.constant 0 : i32
    %c0_i32_0 = arith.constant 0 : i32
    %c0_i32_1 = arith.constant 0 : i32
    return %arg0, %c0_i32, %c0_i32_0 : i32, i32, i32
  }
}

</mosaic_0001>

<bundles_post_ra>
// kernel: tpu_custom_call.1
= control target key start
LH: loop header
LB: loop body
LE: loop exit
PB: predicated region body
PF: predicated region fallthrough
CT: control target
= control target key end

     0   :  { %8 = vsyncpa [#allocation5], 0  ;;  %s918_s0 = inlined_call_operand.hbm [shape: f32[2,32,256], index: 0, kind: input, shape index: {}]   ;;  %s919_s1 = inlined_call_operand.vmem [shape: f32[2,32], index: 1, kind: input, shape index: {}]   ;;  %s920_s2 = inlined_call_operand.vmem [shape: f32[32,2], index: 2, kind: input, shape index: {}]   ;;  %s921_s3 = inlined_call_operand.vmem [shape: f32[2,32,1], index: 3, kind: output, shape index: {}]  }
   0x1   :  { %10 = vsyncpa [#allocation5 + $0x1], 0  ;;  %s801_s12 = smov 0   ;;  %s803_s13 = smov 0  }
   0x2   :  { %s805_s14 = smov 0   ;;  %s807_s15 = smov 0  }
   0x3   :  { %s809_s16 = smov 0   ;;  %s811_s17 = smov 0  }
   0x4 LB: > { %s595_s18 = sadd.s32 4294967295, %s776_s17   ;;  %s28_s19 = sadd.s32 1, %s772_s16  ;;  %s776_s17 = sphi %s811_s17, %s16_s17   ;;  %s772_s16 = sphi %s809_s16, %s928_s16   ;;  %s768_s15 = sphi %s807_s15, %s927_s15   ;;  %s764_s14 = sphi %s805_s14, %s926_s14   ;;  %s760_s13 = sphi %s803_s13, %s925_s13   ;;  %s756_s12 = sphi %s801_s12, %s924_s12  }
   0x5   : > { %p30_p0 = scmp.ge.s32.totalorder %s28_s19, 2  ;;  %s37_s20 = sadd.s32 1, %s764_s14 }
   0x6   : > { %p44_p1 = scmp.ne.s32.totalorder %s764_s14, %s760_s13  ;;  %p45_p2 = scmp.eq.s32.totalorder %s776_s17, 0 }
   0x7   : > { %s930_s19 = smov (%p30_p0, %s28_s19), 0  ;;  %p50_p4 = scmp.ne.s32.totalorder %s760_s13, %s756_s12 }
   0x8   : > { %p837_p3 = por %p45_p2, %p44_p1  ;;  %s32_s22 = ssub.s32 %s772_s16, %s930_s19 }
   0x9   : > { %p51_p5 = scmp.eq.s32.totalorder %s595_s18, 0  ;;  %p35_p6 = scmp.eq.s32.totalorder %s32_s22, 0 }
   0xa   : > { %p628_p8 = scmp.lt.s32.totalorder %s776_s17, 2  ;;  %s148_s25 = sand.u32 1, %s764_s14  }
   0xb   : > { %p844_p7 = por %p51_p5, %p50_p4  ;;  %s618_s26 = sshll.u32 %s772_s16, 6 }
   0xc   : > { %s850_s24 = scalar_select %p35_p6, %s764_s14, %s37_s20  }
   0xd   : > { %s599_s27 = sshll.u32 %s148_s25, 6  ;;  %s159_s30 = scalar_lea.hbm %s918_s0, %s618_s26 }
   0xe   : > { %s160_s4 = sshll.u32 %s159_s30, 4  ;;  %s152_s5 = scalar_lea.vmem [#allocation4], %s599_s27  ;;  %s161_s4 = int_to_ptr.hbm [resolvable:$true] %s160_s4 }
   0xf   : > { %s162_s6 = sshll.u32 %s152_s5, 4  ;;  %p625_p9 = pnand %p628_p8, %p837_p3  ;;  %s163_s6 = int_to_ptr.vmem [resolvable:$true] %s162_s6 }
  0x10   : > { %p602_p10 = scmp.ge.s32.totalorder %s776_s17, 1  ;;  %p170_p11 = scmp.lt.s32.totalorder %s776_s17, 3 }
  0x11   : > { %s149_s7 = scalar_lea.sflag [#allocation5], %s148_s25  ;;  %s778_s8 = smov 256  }
  0x12   : > { %s779_s9 = smov 16   ;;  %p171_p12 = pnand %p602_p10, %p170_p11 }
  0x13   : > { %627 = dma.hbm_to_vmem [thread:$0]  (!%p625_p9), %s161_s4, 1024, %s163_s6, %s149_s7, %s778_s8, %s778_s8, %s779_s9  }
  0x14   : > { %174 = sbr.rel (%p171_p12) target bundleno = 581 (0x245), region = 32  ;;  %s176_s10 = sand.u32 (!%p171_p12), 1, %s760_s13  }
  0x15   : > { %s603_s11 = sshll.u32 (!%p171_p12), %s176_s10, 6  ;;  %s177_s12 = scalar_lea.sflag (!%p171_p12), [#allocation5], %s176_s10 }
  0x16   : > { %s180_s18 = scalar_lea.vmem (!%p171_p12), [#allocation4], %s603_s11 }
  0x19   : > { %751 = dma.done.wait (%p844_p7), %s177_s12, 1024  }
  0x1a   : > { %753 = vsyncadd (%p844_p7), %s177_s12, 4294966272  ;;  %v236_v0 = vld [vmem:[%s180_s18 + $0x30] sm:$0xff]  ;;  %v237_v1 = vld [vmem:[%s180_s18 + $0x38] sm:$0xff]  ;;  %v333_v16 = vlaneseq  ;;  %vm341_vm1 = vcmask 261120   ;;  %vm383_vm2 = vcmask 1041408   ;;  %vm370_vm3 = vcmask 15360  }
  0x1b   : > { %v234_v2 = vld [vmem:[%s180_s18 + $0x20] sm:$0xff]  ;;  %v306_v3 = vadd.f32 %v237_v1, %v236_v0  ;;  %v330_v4 = vmax.f32 %v236_v0, %v237_v1  ;;  %v235_v5 = vld [vmem:[%s180_s18 + $0x28] sm:$0xff]  ;;  %v232_v7 = vld [vmem:[%s180_s18 + $0x10] sm:$0xff]  ;;  %s780_s4 = smov 127   ;;  %p205_p13 = scmp.lt.s32.totalorder %s768_s15, 1  ;;  %vm512_vm6 = vcmask 7168  }
  0x1c   : > { %v327_v6 = vmax.f32 %v234_v2, %v235_v5  ;;  %v233_v8 = vld [vmem:[%s180_s18 + $0x18] sm:$0xff]  ;;  %v230_v9 = vld [vmem:[%s180_s18] sm:$0xff]  ;;  %v231_v10 = vld [vmem:[%s180_s18 + $0x8] sm:$0xff]  ;;  %v303_v11 = vadd.f32 %v235_v5, %v234_v2  ;;  %v334_v17 = vand.u32 127, %v333_v16 }
  0x1d   : > { %307 = vadd.xlane.f32.xlu0 %v306_v3  ;;  %331 = vmax.xlane.f32.xlu1 %v330_v4  ;;  %v300_v12 = vadd.f32 %v233_v8, %v232_v7  ;;  %v297_v13 = vadd.f32 %v231_v10, %v230_v9  ;;  %v324_v14 = vmax.f32 %v232_v7, %v233_v8  ;;  %v340_v34 = vld [vmem:[%s919_s1] sm:$0x3]  ;;  %v367_v38 = vld [vmem:[%s920_s2 + $0x8] sm:$0xff]  ;;  %v369_v39 = vld [vmem:[%s920_s2 + $0x18] sm:$0xff]  ;;  %s932_s15 = smov (!%p205_p13, %s768_s15), 1 }
  0x1e   : > { %328 = vmax.xlane.f32.xlu2 %v327_v6  ;;  %v321_v15 = vmax.f32 %v230_v9, %v231_v10  ;;  %vm335_vm0 = vcmp.eq.s32.totalorder %v334_v17, 0  ;;  %v366_v37 = vld [vmem:[%s920_s2] sm:$0xff]  ;;  %v368_v40 = vld [vmem:[%s920_s2 + $0x10] sm:$0xff]  ;;  %s619_s5 = sshll.u32 %s932_s15, 5 }
  0x1f   : > { %s890_s8 = scalar_lea.vmem %s921_s3, %s619_s5 }
  0x25   : > { %304 = vadd.xlane.f32.xlu0 %v303_v11  ;;  %301 = vadd.xlane.f32.xlu1 %v300_v12 }
  0x26   : > { %298 = vadd.xlane.f32.xlu2 %v297_v13 }
  0x2d   : > { %325 = vmax.xlane.f32.xlu0 %v324_v14  ;;  %322 = vmax.xlane.f32.xlu1 %v321_v15 }
  0x90   : > { %v308_v18 = vpop.xlane.xlu0 %307  ;;  %v332_v19 = vpop.xlane.xlu1 %331 }
  0x91   : > { %v312_v20 = vmul.f32 0.00390625, %v308_v18  ;;  %v329_v21 = vpop.xlane.xlu2 %328 }
  0x93   : > { %v339_v22 = vsel %vm335_vm0, %v312_v20, %v332_v19 }
  0x94   : > { %357 = vmatpush.msra.mxu0 %v339_v22 }
  0x98   : > { %v305_v23 = vpop.xlane.xlu0 %304  ;;  %v302_v24 = vpop.xlane.xlu1 %301 }
  0x99   : > { %v311_v25 = vmul.f32 0.00390625, %v305_v23  ;;  %v299_v26 = vpop.xlane.xlu2 %298  ;;  %v310_v29 = vmul.f32 0.00390625, %v302_v24 }
  0x9a   : > { %v309_v28 = vmul.f32 0.00390625, %v299_v26 }
  0x9b   : > { %v338_v27 = vsel %vm335_vm0, %v311_v25, %v329_v21 }
  0x9c   : > { %358 = vmatpush.msra.mxu0 %v338_v27 }
  0xa0   : > { %v326_v30 = vpop.xlane.xlu0 %325  ;;  %v323_v31 = vpop.xlane.xlu1 %322 }
  0xa1   : > { %v337_v32 = vsel %vm335_vm0, %v310_v29, %v326_v30  ;;  %v336_v33 = vsel %vm335_vm0, %v309_v28, %v323_v31 }
  0xa2   : > { %359 = vmatpush.msra.mxu0 %v337_v32 }
  0xa4   : > { %360 = vmatpush.msra.mxu0 %v336_v33 }
  0xa5   : > { %606 = vmatmul.msk.f32.vlgmr.msra.gmra.mxu0 %vm341_vm1, %v340_v34 }
 0x122   : > { %v362_v35 = vpop.f32.mrf.mxu0 }
 0x123   : > { %v365_v36 = vmax.f32 %v362_v35, 0.0 }
 0x125   : > { %607 = vmatpush.msk.msra.mxu1 %vm383_vm2, %v365_v36  ;;  %620 = vmatpush.msk.msra.mxu2 %vm383_vm2, %v365_v36 }
 0x126   : > { %621 = vmatpush.msk.msra.mxu3 %vm383_vm2, %v365_v36  ;;  %608 = vmatmul.msk.f32.vlgmr.msra.gmra.mxu1 %vm370_vm3, %v366_v37 }
 0x127   : > { %609 = vmatmul.msk.f32.vlgmr.msra.gmra.mxu2 %vm370_vm3, %v367_v38  ;;  %611 = vmatmul.msk.f32.vlgmr.msra.gmra.mxu3 %vm370_vm3, %v369_v39 }
 0x12f   : > { %610 = vmatmul.msk.f32.gmra.mxu2 %vm370_vm3, %v368_v40 }
 0x1a3   : > { %v404_v41 = vpop.f32.mrf.mxu1 }
 0x1a4   : > { %420 = vrot.lane.b32.xlu2 %v404_v41, %s780_s4 }
 0x1aa   : > { %v407_v42 = vpop.f32.mrf.mxu2  ;;  %v413_v43 = vpop.f32.mrf.mxu3 }
 0x1ab   : > { %422 = vrot.lane.b32.xlu0 %v407_v42, %s780_s4 }
 0x1ac   : > { %426 = vrot.lane.b32.xlu2 %v413_v43, %s780_s4 }
 0x1b2   : > { %v410_v44 = vpop.f32.mrf.mxu2 }
 0x1b3   : > { %424 = vrot.lane.b32.xlu1 %v410_v44, %s780_s4 }
 0x1fe   : > { %v421_v45 = vpop.permute.xlu2 %420 }
 0x1ff   : > { %v432_v46 = vadd.f32 %v421_v45, %v404_v41 }
 0x201   : > { %v612_v47 = vmul.f32 -1.442695, %v432_v46 }
 0x203   : > { %680 = vpow2.f32 %v612_v47 }
 0x206   : > { %v427_v48 = vpop.permute.xlu2 %426 }
 0x207   : > { %v435_v49 = vadd.f32 %v427_v48, %v413_v43 }
 0x209   : > { %v681_v50 = vpop.eup %680  ;;  %v615_v51 = vmul.f32 -1.442695, %v435_v49 }
 0x20a   : > { %v448_v52 = vadd.f32 1.0, %v681_v50 }
 0x20b   : > { %682 = vpow2.f32 %v615_v51 }
 0x20c   : > { %684 = vrcp.f32 %v448_v52  ;;  %v463_v58 = vand.u32 2147483648, %v448_v52  ;;  %v461_v60 = vand.u32 2147483647, %v448_v52  ;;  %vm457_vm5 = vweird.f32 %v448_v52 }
 0x20e   : > { %v464_v63 = vor.u32 1.1754944e-38, %v463_v58  ;;  %vm462_vm8 = vcmp.eq.f32.partialorder %v461_v60, 8.507059e+37 }
 0x211   : > { %v683_v53 = vpop.eup %682 }
 0x212   : > { %v685_v54 = vpop.eup %684  ;;  %v451_v55 = vadd.f32 1.0, %v683_v53 }
 0x213   : > { %v453_v56 = vmul.f32 %v685_v54, %v448_v52  ;;  %vm458_vm4 = vweird.f32 %v685_v54 }
 0x214   : > { %686 = vrcp.f32 %v451_v55  ;;  %vm459_vm7 = vmor %vm457_vm5, %vm458_vm4  ;;  %v508_v5 = vand.u32 2147483648, %v451_v55  ;;  %v506_v8 = vand.u32 2147483647, %v451_v55  ;;  %vm502_vm10 = vweird.f32 %v451_v55 }
 0x215   : > { %v454_v57 = vsub.f32 1.0, %v453_v56 }
 0x216   : > { %v509_v11 = vor.u32 1.1754944e-38, %v508_v5  ;;  %vm507_vm12 = vcmp.eq.f32.partialorder %v506_v8, 8.507059e+37 }
 0x217   : > { %v455_v59 = vmul.f32 %v685_v54, %v454_v57 }
 0x219   : > { %v456_v61 = vadd.f32 %v685_v54, %v455_v59 }
 0x21a   : > { %v687_v62 = vpop.eup %686 }
 0x21b   : > { %v460_v0 = vsel %vm459_vm7, %v685_v54, %v456_v61  ;;  %v498_v1 = vmul.f32 %v687_v62, %v451_v55  ;;  %vm503_vm9 = vweird.f32 %v687_v62 }
 0x21c   : > { %v465_v2 = vsel %vm462_vm8, %v464_v63, %v460_v0  ;;  %vm504_vm11 = vmor %vm502_vm10, %vm503_vm9 }
 0x21d   : > { %513 = vst.msk [vmem:[%s890_s8] sm:$0xff] %vm512_vm6, %v465_v2  ;;  %v499_v3 = vsub.f32 1.0, %v498_v1  ;;  %v423_v4 = vpop.permute.xlu0 %422 }
 0x21e   : > { %v433_v6 = vadd.f32 %v423_v4, %v407_v42 }
 0x21f   : > { %v500_v7 = vmul.f32 %v687_v62, %v499_v3 }
 0x220   : > { %v613_v9 = vmul.f32 -1.442695, %v433_v6 }
 0x221   : > { %v501_v10 = vadd.f32 %v687_v62, %v500_v7 }
 0x222   : > { %688 = vpow2.f32 %v613_v9 }
 0x223   : > { %v505_v12 = vsel %vm504_vm11, %v687_v62, %v501_v10 }
 0x224   : > { %v510_v13 = vsel %vm507_vm12, %v509_v11, %v505_v12 }
 0x225   : > { %516 = vst.msk [vmem:[%s890_s8 + $0x18] sm:$0xff] %vm512_vm6, %v510_v13  ;;  %v425_v14 = vpop.permute.xlu1 %424 }
 0x226   : > { %v434_v15 = vadd.f32 %v425_v14, %v410_v44 }
 0x228   : > { %v689_v16 = vpop.eup %688  ;;  %v614_v17 = vmul.f32 -1.442695, %v434_v15 }
 0x229   : > { %v449_v18 = vadd.f32 1.0, %v689_v16 }
 0x22a   : > { %690 = vpow2.f32 %v614_v17 }
 0x22b   : > { %692 = vrcp.f32 %v449_v18  ;;  %v478_v24 = vand.u32 2147483648, %v449_v18  ;;  %v476_v26 = vand.u32 2147483647, %v449_v18  ;;  %vm472_vm14 = vweird.f32 %v449_v18 }
 0x22d   : > { %v479_v29 = vor.u32 1.1754944e-38, %v478_v24  ;;  %vm477_vm0 = vcmp.eq.f32.partialorder %v476_v26, 8.507059e+37 }
 0x230   : > { %v691_v19 = vpop.eup %690 }
 0x231   : > { %v693_v20 = vpop.eup %692  ;;  %v450_v21 = vadd.f32 1.0, %v691_v19 }
 0x232   : > { %v468_v22 = vmul.f32 %v693_v20, %v449_v18  ;;  %vm473_vm13 = vweird.f32 %v693_v20 }
 0x233   : > { %694 = vrcp.f32 %v450_v21  ;;  %vm474_vm15 = vmor %vm472_vm14, %vm473_vm13  ;;  %v493_v34 = vand.u32 2147483648, %v450_v21  ;;  %v491_v36 = vand.u32 2147483647, %v450_v21  ;;  %vm487_vm2 = vweird.f32 %v450_v21 }
 0x234   : > { %v469_v23 = vsub.f32 1.0, %v468_v22 }
 0x235   : > { %v494_v38 = vor.u32 1.1754944e-38, %v493_v34  ;;  %vm492_vm4 = vcmp.eq.f32.partialorder %v491_v36, 8.507059e+37 }
 0x236   : > { %v470_v25 = vmul.f32 %v693_v20, %v469_v23 }
 0x238   : > { %v471_v27 = vadd.f32 %v693_v20, %v470_v25 }
 0x239   : > { %v695_v28 = vpop.eup %694 }
 0x23a   : > { %v475_v30 = vsel %vm474_vm15, %v693_v20, %v471_v27  ;;  %v483_v31 = vmul.f32 %v695_v28, %v450_v21  ;;  %vm488_vm1 = vweird.f32 %v695_v28 }
 0x23b   : > { %v480_v32 = vsel %vm477_vm0, %v479_v29, %v475_v30  ;;  %vm489_vm3 = vmor %vm487_vm2, %vm488_vm1 }
 0x23c   : > { %514 = vst.msk [vmem:[%s890_s8 + $0x8] sm:$0xff] %vm512_vm6, %v480_v32  ;;  %v484_v33 = vsub.f32 1.0, %v483_v31 }
 0x23e   : > { %v485_v35 = vmul.f32 %v695_v28, %v484_v33 }
 0x240   : > { %v486_v37 = vadd.f32 %v695_v28, %v485_v35 }
 0x242   : > { %v490_v39 = vsel %vm489_vm3, %v695_v28, %v486_v37 }
 0x243   : > { %v495_v40 = vsel %vm492_vm4, %v494_v38, %v490_v39 }
 0x244   : > { %515 = vst.msk [vmem:[%s890_s8 + $0x10] sm:$0xff] %vm512_vm6, %v495_v40 }
 0x245 PF: > { %s16_s17 = sadd.s32 1, %s776_s17   ;;  %s924_s12 = smov %s760_s13 }
 0x246   : > { %p13_p0 = scmp.ge.s32.totalorder %s16_s17, 4   ;;  %s925_s13 = smov %s764_s14 }
 0x247   : > { %s926_s14 = smov %s850_s24  ;;  %s927_s15 = smov %s772_s16 }
 0x248   : > { %s928_s16 = smov %s930_s19  ;;  %15 = sbr.rel (!%p13_p0) target bundleno = 4 (0x4), region = 80 }
 0x24d   :  { %538 = vsyncpa [#allocation5], 1 }
 0x24e   :  { %540 = vsyncpa [#allocation5 + $0x1], 1 }

</bundles_post_ra>
